<compile_context>
chip_gen: v5e
topology: v5e:2x2
jax: 0.10.0
libtpu: 0.0.40
codegen_flags: <defaults>
</compile_context>

<pallas_src>
import math
import functools

import jax
import jax.numpy as jnp
from jax.experimental import pallas as pl
from jax.experimental.pallas import tpu as pltpu


# ----------------------------------------------------------------------------
# PE table generation (plain-JAX glue) -- matches torch _generate_pe exactly.
# ----------------------------------------------------------------------------
def generate_pe(d_model: int, max_len: int) -> jnp.ndarray:
    position = jnp.arange(0, max_len, dtype=jnp.float32)[:, None]            # (L, 1)
    div_term = jnp.exp(
        jnp.arange(0, d_model, 2, dtype=jnp.float32) * (-math.log(10000.0) / d_model)
    )                                                                        # (D/2,)
    angles = position * div_term                                             # (L, D/2)
    pe = jnp.zeros((max_len, d_model), dtype=jnp.float32)
    pe = pe.at[:, 0::2].set(jnp.sin(angles))
    pe = pe.at[:, 1::2].set(jnp.cos(angles))
    return pe                                                                # (L, D)


# ----------------------------------------------------------------------------
# Kernels
# ----------------------------------------------------------------------------
def _pe_add_kernel(x_ref, pe_ref, o_ref):
    # x_ref / o_ref: (TB, TF); pe_ref: (1, TF) -- sublane broadcast over batch rows.
    o_ref[...] = x_ref[...] + pe_ref[...]


def _pe_add_dropout_kernel(x_ref, pe_ref, bits_ref, o_ref, *, threshold, scale):
    # x_ref / o_ref / bits_ref: (TB, TF); pe_ref: (1, TF)
    y = x_ref[...] + pe_ref[...]
    keep = bits_ref[...] >= jnp.uint32(threshold)          # integer-domain keep test
    o_ref[...] = jnp.where(keep, y * jnp.float32(scale), jnp.zeros_like(y))


# ----------------------------------------------------------------------------
# Wrapper
# ----------------------------------------------------------------------------
def positional_encoding_forward(x, pe, *, dropout_rate=0.1, training=False,
                                rng_key=None, block_elems=256 * 1024):
    """x: (B, S, D) float32; pe: (max_len, D) float32. Returns (B, S, D)."""
    B, S, D = x.shape
    max_len = pe.shape[0]
    if S > max_len:
        raise ValueError(
            f"Input sequence length ({S}) exceeds the maximum allowed length ({max_len})."
        )

    # Lane-dense flattening: (B, S, D) -> (B, F) with F = S*D.
    F = S * D
    x_flat = x.reshape(B, F)
    pe_flat = pe[:S, :].reshape(1, F).astype(x.dtype)

    # Tile sizes: batch tile TB (full batch if small, else 8 sublanes);
    # feature tile TF (multiple of 128 lanes, ~block_elems elements per x block).
    TB = B if B <= 8 else 8
    tf_target = max(128, block_elems // TB)
    TF = F if F <= tf_target else (tf_target // 128) * 128
    # Batch is the inner (fast) grid axis -> PE tile stays resident across it.
    grid = (pl.cdiv(F, TF), pl.cdiv(B, TB))

    x_spec = pl.BlockSpec((TB, TF), lambda f, b: (b, f))
    pe_spec = pl.BlockSpec((1, TF), lambda f, b: (0, f))
    out_spec = pl.BlockSpec((TB, TF), lambda f, b: (b, f))
    out_shape = jax.ShapeDtypeStruct((B, F), x.dtype)
    compiler_params = pltpu.CompilerParams(
        dimension_semantics=("parallel", "parallel"))
    itemsize = x.dtype.itemsize

    if (not training) or dropout_rate == 0.0:
        # Eval path: dropout is identity.
        cost = pl.CostEstimate(flops=B * F, transcendentals=0,
                               bytes_accessed=(2 * B * F + F) * itemsize)
        y_flat = pl.pallas_call(
            _pe_add_kernel,
            out_shape=out_shape,
            grid_spec=pltpu.PrefetchScalarGridSpec(
                num_scalar_prefetch=0, grid=grid,
                in_specs=[x_spec, pe_spec], out_specs=out_spec),
            compiler_params=compiler_params,
            cost_estimate=cost,
        )(x_flat, pe_flat)
        return y_flat.reshape(B, S, D)

    # Training path: inverted dropout with precomputed uint32 bits (portable PRNG).
    if rng_key is None:
        rng_key = jax.random.PRNGKey(0)
    rate = float(dropout_rate)
    threshold = min(int(round(rate * (1 << 32))), (1 << 32) - 1)
    scale = 1.0 / (1.0 - rate)
    bits = jax.random.bits(rng_key, (B, F), dtype=jnp.uint32)

    kernel = functools.partial(_pe_add_dropout_kernel,
                               threshold=threshold, scale=scale)
    cost = pl.CostEstimate(flops=3 * B * F, transcendentals=0,
                           bytes_accessed=(3 * B * F + F) * itemsize)
    y_flat = pl.pallas_call(
        kernel,
        out_shape=out_shape,
        grid_spec=pltpu.PrefetchScalarGridSpec(
            num_scalar_prefetch=0, grid=grid,
            in_specs=[x_spec, pe_spec, x_spec], out_specs=out_spec),
        compiler_params=compiler_params,
        cost_estimate=cost,
    )(x_flat, pe_flat, bits)
    return y_flat.reshape(B, S, D)


# ----------------------------------------------------------------------------
# Main
# ----------------------------------------------------------------------------
if __name__ == "__main__":
    B, S, D = 2, 8, 32
    MAX_LEN = 64

    root = jax.random.PRNGKey(0)
    kx, kdrop = jax.random.split(root)
    x = jax.random.normal(kx, (B, S, D), dtype=jnp.float32)
    pe = generate_pe(D, MAX_LEN)
    ref = x + pe[None, :S, :]

    # 1) Eval path (dropout = identity), single block per grid step.
    y_eval = jax.block_until_ready(
        positional_encoding_forward(x, pe, dropout_rate=0.1, training=False))
    assert y_eval.shape == (B, S, D)
    assert jnp.allclose(y_eval, ref, atol=1e-6), "eval-mode mismatch"

    # 2) Eval path with tiny tiles to exercise the (feature, batch) grid path.
    y_tiled = jax.block_until_ready(
        positional_encoding_forward(x, pe, dropout_rate=0.1, training=False,
                                    block_elems=256))
    assert jnp.allclose(y_tiled, ref, atol=1e-6), "tiled eval mismatch"

    # 3) Training path (inverted dropout), checked against an exact reference
    #    built from the same uint32 bit stream.
    rate = 0.25
    y_train = jax.block_until_ready(
        positional_encoding_forward(x, pe, dropout_rate=rate, training=True,
                                    rng_key=kdrop))
    bits = jax.random.bits(kdrop, (B, S * D), dtype=jnp.uint32).reshape(B, S, D)
    threshold = min(int(round(rate * (1 << 32))), (1 << 32) - 1)
    keep = bits >= jnp.uint32(threshold)
    ref_train = jnp.where(keep, ref * (1.0 / (1.0 - rate)), 0.0)
    assert jnp.allclose(y_train, ref_train, atol=1e-5), "train-mode mismatch"

    print("KERNEL_OK")
</pallas_src>

<mosaic_0001>
module attributes {stable_mosaic.version = 11 : i64} {
  func.func @_pe_add_kernel(%arg0: i32, %arg1: i32, %arg2: memref<2x256xf32, #tpu.memory_space<vmem>>, %arg3: memref<1x256xf32, #tpu.memory_space<vmem>>, %arg4: memref<2x256xf32, #tpu.memory_space<vmem>>) attributes {dimension_semantics = [#tpu.dimension_semantics<parallel>, #tpu.dimension_semantics<parallel>], iteration_bounds = array<i64: 1, 1>, scalar_prefetch = 0 : i64, scratch_operands = 0 : i64, tpu.core_type = #tpu.core_type<tc>, window_params = [{transform_indices = @transform_0, window_bounds = array<i64: 2, 256>}, {transform_indices = @transform_1, window_bounds = array<i64: 1, 256>}, {transform_indices = @transform_2, window_bounds = array<i64: 2, 256>}]} {
    %c0 = arith.constant 0 : index
    %c0_0 = arith.constant 0 : index
    %0 = vector.load %arg2[%c0, %c0_0] : memref<2x256xf32, #tpu.memory_space<vmem>>, vector<2x256xf32>
    %c0_1 = arith.constant 0 : index
    %c0_2 = arith.constant 0 : index
    %1 = vector.load %arg3[%c0_1, %c0_2] : memref<1x256xf32, #tpu.memory_space<vmem>>, vector<1x256xf32>
    %2 = vector.broadcast %1 : vector<1x256xf32> to vector<2x256xf32>
    %3 = arith.addf %0, %2 : vector<2x256xf32>
    %c0_3 = arith.constant 0 : index
    %c0_4 = arith.constant 0 : index
    %4 = vector.load %arg4[%c0_3, %c0_4] : memref<2x256xf32, #tpu.memory_space<vmem>>, vector<2x256xf32>
    tpu.vector_store %arg4[%c0_3, %c0_4], %3 {strides = array<i32>} : memref<2x256xf32, #tpu.memory_space<vmem>>, vector<2x256xf32>,
    return
  }
  func.func @transform_0(%arg0: i32, %arg1: i32) -> (i32, i32) {
    %c0_i32 = arith.constant 0 : i32
    return %arg1, %arg0 : i32, i32
  }
  func.func @transform_1(%arg0: i32, %arg1: i32) -> (i32, i32) {
    %c0_i32 = arith.constant 0 : i32
    %c0_i32_0 = arith.constant 0 : i32
    return %c0_i32, %arg0 : i32, i32
  }
  func.func @transform_2(%arg0: i32, %arg1: i32) -> (i32, i32) {
    %c0_i32 = arith.constant 0 : i32
    return %arg1, %arg0 : i32, i32
  }
}

</mosaic_0001>

<bundles_post_ra>
// kernel: tpu_custom_call.1
= control target key start
LH: loop header
LB: loop body
LE: loop exit
PB: predicated region body
PF: predicated region fallthrough
CT: control target
= control target key end

     0   :  { %7 = vsyncpa [#allocation3], 0  ;;  %s177_s0 = inlined_call_operand.hbm [shape: f32[2,256], index: 0, kind: input, shape index: {}]   ;;  %s178_s1 = inlined_call_operand.hbm [shape: f32[1,256], index: 1, kind: input, shape index: {}]   ;;  %s179_s2 = inlined_call_operand.hbm [shape: f32[2,256], index: 2, kind: output, shape index: {}]  }
   0x1   :  { %8 = vsyncpa [#allocation6], 0 }
   0x2   :  { %9 = vsyncpa [#allocation4], 0  ;;  %s15_s11 = sshll.u32 %s177_s0, 4  ;;  %s150_s12 = smov [#allocation2]   ;;  %s16_s11 = int_to_ptr.hbm [resolvable:$true] %s15_s11 }
   0x3   :  { %s17_s13 = sshll.u32 %s150_s12, 4  ;;  %s26_s16 = sshll.u32 %s178_s1, 4  ;;  %s18_s13 = int_to_ptr.vmem [resolvable:$true] %s17_s13  ;;  %s27_s16 = int_to_ptr.hbm [resolvable:$true] %s26_s16 }
   0x4   :  { %20 = dma.hbm_to_vmem [thread:$0]  %s16_s11, 64, %s18_s13, [#allocation3]  }
   0x5   :  { %s151_s17 = smov [#allocation5]  }
   0x6   :  { %s28_s18 = sshll.u32 %s151_s17, 4  ;;  %s29_s18 = int_to_ptr.vmem [resolvable:$true] %s28_s18 }
   0x7   :  { %31 = dma.hbm_to_vmem [thread:$0]  %s27_s16, 32, %s29_s18, [#allocation6]  }
   0x8   :  { %144 = dma.done.wait [#allocation3], 64  }
   0x9   :  { %145 = vsyncadd [#allocation3], 4294967232 }
   0xa   :  { %146 = dma.done.wait [#allocation6], 32  }
   0xb   :  { %147 = vsyncadd [#allocation6], 4294967264  ;;  %v41_v0 = vld [vmem:[#allocation5] sm:$0x3]  ;;  %vm46_vm0 = vcmask 1041408   ;;  %s152_s0 = smov [#allocation7]  }
   0xc   :  { %v43_v1 = vperm.slane %v41_v0, 0  ;;  %v44_v2 = vperm.slane %v41_v0, 1  ;;  %v40_v3 = vld [vmem:[#allocation2] sm:$0xf]  ;;  %s56_s19 = sshll.u32 %s152_s0, 4  ;;  %s58_s21 = sshll.u32 %s179_s2, 4  ;;  %s57_s19 = int_to_ptr.vmem [resolvable:$true] %s56_s19  ;;  %s59_s21 = int_to_ptr.hbm [resolvable:$true] %s58_s21 }
   0xe   :  { %v45_v4 = vrot.slane %v44_v2, 6 }
  0x10   :  { %v47_v5 = vsel %vm46_vm0, %v43_v1, %v45_v4 }
  0x11   :  { %v49_v6 = vadd.f32 %v47_v5, %v40_v3 }
  0x13   :  { %50 = vst [vmem:[#allocation7] sm:$0xf] %v49_v6 }
  0x14   :  { %61 = dma.vmem_to_hbm [thread:$0]  %s57_s19, 64, %s59_s21, [#allocation4]  }
  0x15   :  { %148 = dma.done.wait [#allocation4], 64  }
  0x16   :  { %149 = vsyncadd [#allocation4], 4294967232 }
  0x17   :  { %66 = vsyncpa [#allocation3], 1 }
  0x18   :  { %67 = vsyncpa [#allocation6], 1 }
  0x19   :  { %68 = vsyncpa [#allocation4], 1 }

</bundles_post_ra>
